<compile_context>
chip_gen: v6e
topology: v6e:2x2x1
jax: 0.10.0
libtpu: 0.0.40
codegen_flags: <defaults>
</compile_context>

<pallas_src>
import functools
import math

import jax
import jax.numpy as jnp
from jax import lax
from jax.experimental import pallas as pl
from jax.experimental.pallas import tpu as pltpu


_SQRT_2_OVER_PI = math.sqrt(2.0 / math.pi)
_LN_EPS = 1e-5


# ----------------------------- kernel helpers -------------------------------

def _layernorm_f32(x, gamma, beta):
    # unbiased=False variance, matches the PyTorch LayerNorm in the spec. Always f32.
    x = x.astype(jnp.float32)
    mean = jnp.mean(x, axis=-1, keepdims=True)
    var = jnp.mean((x - mean) ** 2, axis=-1, keepdims=True)
    return (x - mean) * lax.rsqrt(var + _LN_EPS) * gamma.astype(jnp.float32) \
        + beta.astype(jnp.float32)


def _gelu_tanh_f32(x):
    # 0.5 * x * (1 + tanh(sqrt(2/pi) * (x + 0.044715 * x^3))), f32 elementwise.
    inner = _SQRT_2_OVER_PI * (x + 0.044715 * (x * x * x))
    return 0.5 * x * (1.0 + jnp.tanh(inner))


# ------------------------------ Pallas kernels ------------------------------

def _attn_block_kernel(x_ref, g_ref, b_ref, wq_ref, wk_ref, wv_ref, wo_ref,
                       bo_ref, o_ref, xn_ref, acc_ref, *, head_dim, compute_dtype):
    """One (batch, head) grid step of  y = x + OutProj(CausalMHA(LN1(x)))."""
    h = pl.program_id(1)

    @pl.when(h == 0)
    def _init():
        xn_ref[...] = _layernorm_f32(x_ref[...], g_ref[...], b_ref[...])
        acc_ref[...] = jnp.zeros_like(acc_ref)

    xn = xn_ref[...].astype(compute_dtype)                       # MXU operand dtype
    q = jnp.dot(xn, wq_ref[...].astype(compute_dtype),
                preferred_element_type=jnp.float32)              # (T, hd)
    k = jnp.dot(xn, wk_ref[...].astype(compute_dtype),
                preferred_element_type=jnp.float32)
    v = jnp.dot(xn, wv_ref[...].astype(compute_dtype),
                preferred_element_type=jnp.float32)

    T = q.shape[0]
    # q @ k^T without an explicit transpose: contract last dims of both operands.
    s = lax.dot_general(q.astype(compute_dtype), k.astype(compute_dtype),
                        (((1,), (1,)), ((), ())),
                        preferred_element_type=jnp.float32)      # (T, T) f32
    s = s * (1.0 / math.sqrt(head_dim))
    row = lax.broadcasted_iota(jnp.int32, (T, T), 0)
    col = lax.broadcasted_iota(jnp.int32, (T, T), 1)
    s = jnp.where(row >= col, s, jnp.float32(-1e30))             # causal mask
    s = s - jnp.max(s, axis=-1, keepdims=True)
    p = jnp.exp(s)
    p = p * pl.reciprocal(jnp.sum(p, axis=-1, keepdims=True), approx=True)

    ctx = jnp.dot(p.astype(compute_dtype), v.astype(compute_dtype),
                  preferred_element_type=jnp.float32)            # (T, hd)
    # concat_h(ctx_h) @ Wo == sum_h ctx_h @ Wo[h]  -> accumulate in f32 scratch.
    acc_ref[...] += jnp.dot(ctx.astype(compute_dtype), wo_ref[...].astype(compute_dtype),
                            preferred_element_type=jnp.float32)  # (T, D)

    @pl.when(h == pl.num_programs(1) - 1)
    def _finalize():
        out = x_ref[...].astype(jnp.float32) + acc_ref[...] + bo_ref[...].astype(jnp.float32)
        o_ref[...] = out.astype(o_ref.dtype)                     # fused residual add


def _mlp_block_kernel(x_ref, g_ref, b_ref, w1_ref, b1_ref, w2_ref, b2_ref,
                      o_ref, xn_ref, acc_ref, *, compute_dtype):
    """One (batch, q-tile, ff-tile) grid step of  out = x + FFN(LN2(x))."""
    f = pl.program_id(2)

    @pl.when(f == 0)
    def _init():
        xn_ref[...] = _layernorm_f32(x_ref[...], g_ref[...], b_ref[...])
        acc_ref[...] = jnp.zeros_like(acc_ref)

    hidden = jnp.dot(xn_ref[...].astype(compute_dtype), w1_ref[...].astype(compute_dtype),
                     preferred_element_type=jnp.float32)         # (tq, tff) f32
    hidden = _gelu_tanh_f32(hidden + b1_ref[...].astype(jnp.float32))   # GELU in epilogue
    acc_ref[...] += jnp.dot(hidden.astype(compute_dtype), w2_ref[...].astype(compute_dtype),
                            preferred_element_type=jnp.float32)  # (tq, D)

    @pl.when(f == pl.num_programs(2) - 1)
    def _finalize():
        out = x_ref[...].astype(jnp.float32) + acc_ref[...] + b2_ref[...].astype(jnp.float32)
        o_ref[...] = out.astype(o_ref.dtype)                     # fused residual add


# ------------------------------ host wrappers -------------------------------

def _vmem_limit_bytes():
    # Per-generation scoped VMEM budget: ~3/4 of physical VMEM
    # (~96 MiB on v5e/v6e's 128 MiB, ~48 MiB on v7x's 64 MiB).
    try:
        cap = int(pltpu.get_tpu_info().vmem_capacity_bytes)
    except Exception:
        cap = 64 * 1024 * 1024           # conservative fallback (v7x-sized)
    return int(cap * 3 // 4)


def _pick_tile(n, cap, quantum):
    """Largest tile <= cap that divides n and is a multiple of `quantum`;
    falls back to the full dimension (always a legal block)."""
    if n <= cap:
        return n
    best = None
    t = quantum
    while t <= cap:
        if n % t == 0:
            best = t
        t += quantum
    return best if best is not None else n


def transformer_block_pallas(x, params, *, n_heads, compute_dtype=None):
    """Eval-mode forward of the pre-LN GPT TransformerBlock.

    compute_dtype: dtype fed to the MXU at the dot call sites (use jnp.bfloat16 in
    production — MXU peak is bf16); accumulation is always f32 via
    preferred_element_type.  Defaults to the input dtype (exact f32 path).
    """
    B, T, D = x.shape
    Dff = params["w1"].shape[1]
    head_dim = D // n_heads
    assert head_dim * n_heads == D
    dtype = x.dtype
    isz = jnp.dtype(dtype).itemsize
    if compute_dtype is None:
        compute_dtype = dtype

    vmem_limit = _vmem_limit_bytes()

    # Host-side (one-off) reshape so each head's weight slab is a clean BlockSpec
    # block -> no in-kernel lane slicing or transposes.
    wq_h = params["wq"].reshape(D, n_heads, head_dim).transpose(1, 0, 2)   # (H, D, hd)
    wk_h = params["wk"].reshape(D, n_heads, head_dim).transpose(1, 0, 2)   # (H, D, hd)
    wv_h = params["wv"].reshape(D, n_heads, head_dim).transpose(1, 0, 2)   # (H, D, hd)
    wo_h = params["wo"].reshape(n_heads, head_dim, D)                      # (H, hd, D)

    # ---- Kernel A: y = x + Attn(LN1(x)), grid (B, H) ----
    xspec2 = pl.BlockSpec((None, T, D), lambda b, h: (b, 0, 0))
    attn_flops = int(B * (8 * T * D * D + 4 * T * T * D))
    attn_bytes = int((2 * B * T * D + 4 * D * D + 3 * D) * isz)
    y = pl.pallas_call(
        functools.partial(_attn_block_kernel, head_dim=head_dim,
                          compute_dtype=compute_dtype),
        out_shape=jax.ShapeDtypeStruct((B, T, D), dtype),
        grid_spec=pltpu.PrefetchScalarGridSpec(
            num_scalar_prefetch=0,
            grid=(B, n_heads),
            in_specs=[
                xspec2,
                pl.BlockSpec((1, D), lambda b, h: (0, 0)),                  # ln1 gamma
                pl.BlockSpec((1, D), lambda b, h: (0, 0)),                  # ln1 beta
                pl.BlockSpec((None, D, head_dim), lambda b, h: (h, 0, 0)),  # Wq head slab
                pl.BlockSpec((None, D, head_dim), lambda b, h: (h, 0, 0)),  # Wk head slab
                pl.BlockSpec((None, D, head_dim), lambda b, h: (h, 0, 0)),  # Wv head slab
                pl.BlockSpec((None, head_dim, D), lambda b, h: (h, 0, 0)),  # Wo head slab
                pl.BlockSpec((1, D), lambda b, h: (0, 0)),                  # out-proj bias
            ],
            out_specs=xspec2,
            scratch_shapes=[pltpu.VMEM((T, D), jnp.float32),    # LN1(x) cache
                            pltpu.VMEM((T, D), jnp.float32)],   # output accumulator
        ),
        compiler_params=pltpu.CompilerParams(
            dimension_semantics=("parallel", "arbitrary"),
            vmem_limit_bytes=vmem_limit),
        cost_estimate=pl.CostEstimate(flops=attn_flops,
                                      transcendentals=int(B * n_heads * T * T),
                                      bytes_accessed=attn_bytes),
    )(x, params["ln1_g"], params["ln1_b"], wq_h, wk_h, wv_h, wo_h, params["bo"])

    # ---- Kernel B: out = y + FFN(LN2(y)), grid (B, T-tiles, Dff-tiles) ----
    tq = _pick_tile(T, 256, 8)        # query-row tile (sublane multiple / MXU rows)
    tff = _pick_tile(Dff, 512, 128)   # Dff reduction tile (lane multiple, 256-MXU friendly)
    n_qt = T // tq
    n_ft = Dff // tff

    xspec3 = pl.BlockSpec((None, tq, D), lambda b, q, f: (b, q, 0))
    mlp_flops = int(B * 4 * T * D * Dff)
    mlp_bytes = int((2 * B * T * D + 2 * D * Dff + Dff + 3 * D) * isz)
    out = pl.pallas_call(
        functools.partial(_mlp_block_kernel, compute_dtype=compute_dtype),
        out_shape=jax.ShapeDtypeStruct((B, T, D), dtype),
        grid_spec=pltpu.PrefetchScalarGridSpec(
            num_scalar_prefetch=0,
            grid=(B, n_qt, n_ft),
            in_specs=[
                xspec3,
                pl.BlockSpec((1, D), lambda b, q, f: (0, 0)),     # ln2 gamma
                pl.BlockSpec((1, D), lambda b, q, f: (0, 0)),     # ln2 beta
                pl.BlockSpec((D, tff), lambda b, q, f: (0, f)),   # W1 column tile
                pl.BlockSpec((1, tff), lambda b, q, f: (0, f)),   # b1 tile
                pl.BlockSpec((tff, D), lambda b, q, f: (f, 0)),   # W2 row tile
                pl.BlockSpec((1, D), lambda b, q, f: (0, 0)),     # b2
            ],
            out_specs=xspec3,
            scratch_shapes=[pltpu.VMEM((tq, D), jnp.float32),     # LN2(y) cache
                            pltpu.VMEM((tq, D), jnp.float32)],    # MLP accumulator
        ),
        compiler_params=pltpu.CompilerParams(
            dimension_semantics=("parallel", "parallel", "arbitrary"),
            vmem_limit_bytes=vmem_limit),
        cost_estimate=pl.CostEstimate(flops=mlp_flops,
                                      transcendentals=int(B * T * Dff),
                                      bytes_accessed=mlp_bytes),
    )(y, params["ln2_g"], params["ln2_b"],
      params["w1"], params["b1"], params["w2"], params["b2"])

    return out


# ------------------------------- reference ----------------------------------

def transformer_block_ref(x, p, *, n_heads):
    def ln(v, g, b):
        m = jnp.mean(v, axis=-1, keepdims=True)
        var = jnp.mean((v - m) ** 2, axis=-1, keepdims=True)
        return (v - m) / jnp.sqrt(var + _LN_EPS) * g + b

    B, T, D = x.shape
    hd = D // n_heads

    xn = ln(x, p["ln1_g"], p["ln1_b"])
    q = xn @ p["wq"]
    k = xn @ p["wk"]
    v = xn @ p["wv"]
    q = q.reshape(B, T, n_heads, hd).transpose(0, 2, 1, 3)
    k = k.reshape(B, T, n_heads, hd).transpose(0, 2, 1, 3)
    v = v.reshape(B, T, n_heads, hd).transpose(0, 2, 1, 3)
    s = jnp.einsum("bhqd,bhkd->bhqk", q, k) / math.sqrt(hd)
    causal = jnp.tril(jnp.ones((T, T), dtype=bool))
    s = jnp.where(causal, s, -jnp.inf)
    w = jax.nn.softmax(s, axis=-1)
    ctx = jnp.einsum("bhqk,bhkd->bhqd", w, v).transpose(0, 2, 1, 3).reshape(B, T, D)
    y = x + (ctx @ p["wo"] + p["bo"])

    yn = ln(y, p["ln2_g"], p["ln2_b"])
    h = yn @ p["w1"] + p["b1"]
    h = 0.5 * h * (1.0 + jnp.tanh(_SQRT_2_OVER_PI * (h + 0.044715 * h ** 3)))
    return y + (h @ p["w2"] + p["b2"])


def init_params(key, emb_dim, dtype=jnp.float32):
    D = emb_dim
    Dff = 4 * D
    ks = jax.random.split(key, 12)
    s = 0.1
    return {
        "ln1_g": 1.0 + s * jax.random.normal(ks[0], (1, D), dtype),
        "ln1_b": s * jax.random.normal(ks[1], (1, D), dtype),
        "ln2_g": 1.0 + s * jax.random.normal(ks[2], (1, D), dtype),
        "ln2_b": s * jax.random.normal(ks[3], (1, D), dtype),
        "wq": s * jax.random.normal(ks[4], (D, D), dtype),
        "wk": s * jax.random.normal(ks[5], (D, D), dtype),
        "wv": s * jax.random.normal(ks[6], (D, D), dtype),
        "wo": s * jax.random.normal(ks[7], (D, D), dtype),
        "bo": s * jax.random.normal(ks[8], (1, D), dtype),
        "w1": s * jax.random.normal(ks[9], (D, Dff), dtype),
        "b1": s * jax.random.normal(ks[10], (1, Dff), dtype),
        "w2": s * jax.random.normal(ks[11], (Dff, D), dtype),
        "b2": jnp.zeros((1, D), dtype),
    }


if __name__ == "__main__":
    # Small config consistent with the module: batch=2, seq=8, emb_dim=32, 4 heads.
    B, T, D, H = 2, 8, 32, 4
    key = jax.random.PRNGKey(0)
    kx, kp = jax.random.split(key)
    x = jax.random.normal(kx, (B, T, D), dtype=jnp.float32)
    params = init_params(kp, D)

    y_ref = transformer_block_ref(x, params, n_heads=H)

    # Exact path: f32 MXU operands (strict correctness check).
    y32 = jax.block_until_ready(
        transformer_block_pallas(x, params, n_heads=H, compute_dtype=jnp.float32))
    assert y32.shape == x.shape and y32.dtype == x.dtype
    err32 = float(jnp.max(jnp.abs(y32 - y_ref)))
    assert err32 < 3e-2, f"f32 path mismatch vs reference, max_err={err32}"

    # Production path: bf16 MXU operands, f32 accumulation (looser check).
    ybf = jax.block_until_ready(
        transformer_block_pallas(x, params, n_heads=H, compute_dtype=jnp.bfloat16))
    errbf = float(jnp.max(jnp.abs(ybf - y_ref)))
    assert errbf < 2e-1, f"bf16 path mismatch vs reference, max_err={errbf}"

    print("KERNEL_OK")
</pallas_src>

<mosaic_0001>
module attributes {stable_mosaic.version = 11 : i64} {
  func.func @_attn_block_kernel(%arg0: i32, %arg1: i32, %arg2: memref<1x8x32xf32, #tpu.memory_space<vmem>>, %arg3: memref<1x32xf32, #tpu.memory_space<vmem>>, %arg4: memref<1x32xf32, #tpu.memory_space<vmem>>, %arg5: memref<1x32x8xf32, #tpu.memory_space<vmem>>, %arg6: memref<1x32x8xf32, #tpu.memory_space<vmem>>, %arg7: memref<1x32x8xf32, #tpu.memory_space<vmem>>, %arg8: memref<1x8x32xf32, #tpu.memory_space<vmem>>, %arg9: memref<1x32xf32, #tpu.memory_space<vmem>>, %arg10: memref<1x8x32xf32, #tpu.memory_space<vmem>>, %arg11: memref<8x32xf32, #tpu.memory_space<vmem>>, %arg12: memref<8x32xf32, #tpu.memory_space<vmem>>) attributes {dimension_semantics = [#tpu.dimension_semantics<parallel>, #tpu.dimension_semantics<arbitrary>], iteration_bounds = array<i64: 2, 4>, scalar_prefetch = 0 : i64, scratch_operands = 2 : i64, tpu.core_type = #tpu.core_type<tc>, window_params = [{transform_indices = @transform_0, window_bounds = array<i64: 1, 8, 32>}, {pipeline_mode = #tpu.pipeline_mode<synchronous>, transform_indices = @transform_1, window_bounds = array<i64: 1, 32>}, {pipeline_mode = #tpu.pipeline_mode<synchronous>, transform_indices = @transform_2, window_bounds = array<i64: 1, 32>}, {transform_indices = @transform_3, window_bounds = array<i64: 1, 32, 8>}, {transform_indices = @transform_4, window_bounds = array<i64: 1, 32, 8>}, {transform_indices = @transform_5, window_bounds = array<i64: 1, 32, 8>}, {transform_indices = @transform_6, window_bounds = array<i64: 1, 8, 32>}, {pipeline_mode = #tpu.pipeline_mode<synchronous>, transform_indices = @transform_7, window_bounds = array<i64: 1, 32>}, {transform_indices = @transform_8, window_bounds = array<i64: 1, 8, 32>}]} {
    %c0_i32 = arith.constant 0 : i32
    %0 = arith.cmpi eq, %arg1, %c0_i32 : i32
    %1 = arith.extui %0 : i1 to i32
    %c0_i32_0 = arith.constant 0 : i32
    %2 = arith.cmpi ne, %1, %c0_i32_0 : i32
    scf.if %2 {
      %c0_28 = arith.constant 0 : index
      %c0_29 = arith.constant 0 : index
      %c0_30 = arith.constant 0 : index
      %41 = vector.load %arg2[%c0_28, %c0_29, %c0_30] : memref<1x8x32xf32, #tpu.memory_space<vmem>>, vector<1x8x32xf32>
      %42 = vector.shape_cast %41 : vector<1x8x32xf32> to vector<8x32xf32>
      %c0_31 = arith.constant 0 : index
      %c0_32 = arith.constant 0 : index
      %43 = vector.load %arg3[%c0_31, %c0_32] : memref<1x32xf32, #tpu.memory_space<vmem>>, vector<1x32xf32>
      %c0_33 = arith.constant 0 : index
      %c0_34 = arith.constant 0 : index
      %44 = vector.load %arg4[%c0_33, %c0_34] : memref<1x32xf32, #tpu.memory_space<vmem>>, vector<1x32xf32>
      %cst_35 = arith.constant dense<0.000000e+00> : vector<8xf32>
      %45 = vector.multi_reduction <add>, %42, %cst_35 [1] : vector<8x32xf32> to vector<8xf32>
      %46 = vector.shape_cast %45 : vector<8xf32> to vector<8x1xf32>
      %cst_36 = arith.constant 3.200000e+01 : f32
      %47 = vector.broadcast %cst_36 : f32 to vector<8x1xf32>
      %48 = arith.divf %46, %47 : vector<8x1xf32>
      %49 = vector.broadcast %48 : vector<8x1xf32> to vector<8x32xf32>
      %50 = arith.subf %42, %49 : vector<8x32xf32>
      %51 = arith.mulf %50, %50 : vector<8x32xf32>
      %cst_37 = arith.constant dense<0.000000e+00> : vector<8xf32>
      %52 = vector.multi_reduction <add>, %51, %cst_37 [1] : vector<8x32xf32> to vector<8xf32>
      %53 = vector.shape_cast %52 : vector<8xf32> to vector<8x1xf32>
      %cst_38 = arith.constant 3.200000e+01 : f32
      %54 = vector.broadcast %cst_38 : f32 to vector<8x1xf32>
      %55 = arith.divf %53, %54 : vector<8x1xf32>
      %56 = vector.broadcast %48 : vector<8x1xf32> to vector<8x32xf32>
      %57 = arith.subf %42, %56 : vector<8x32xf32>
      %cst_39 = arith.constant 9.99999974E-6 : f32
      %58 = vector.broadcast %cst_39 : f32 to vector<8x1xf32>
      %59 = arith.addf %55, %58 : vector<8x1xf32>
      %60 = math.rsqrt %59 : vector<8x1xf32>
      %61 = vector.broadcast %60 : vector<8x1xf32> to vector<8x32xf32>
      %62 = arith.mulf %57, %61 : vector<8x32xf32>
      %63 = vector.broadcast %43 : vector<1x32xf32> to vector<8x32xf32>
      %64 = arith.mulf %62, %63 : vector<8x32xf32>
      %65 = vector.broadcast %44 : vector<1x32xf32> to vector<8x32xf32>
      %66 = arith.addf %64, %65 : vector<8x32xf32>
      %c0_40 = arith.constant 0 : index
      %c0_41 = arith.constant 0 : index
      %67 = vector.load %arg11[%c0_40, %c0_41] : memref<8x32xf32, #tpu.memory_space<vmem>>, vector<8x32xf32>
      tpu.vector_store %arg11[%c0_40, %c0_41], %66 {strides = array<i32>} : memref<8x32xf32, #tpu.memory_space<vmem>>, vector<8x32xf32>,
      %cst_42 = arith.constant 0.000000e+00 : f32
      %68 = vector.broadcast %cst_42 : f32 to vector<8x32xf32>
      %c0_43 = arith.constant 0 : index
      %c0_44 = arith.constant 0 : index
      %69 = vector.load %arg12[%c0_43, %c0_44] : memref<8x32xf32, #tpu.memory_space<vmem>>, vector<8x32xf32>
      tpu.vector_store %arg12[%c0_43, %c0_44], %68 {strides = array<i32>} : memref<8x32xf32, #tpu.memory_space<vmem>>, vector<8x32xf32>,
    } else {
    }
    %c0 = arith.constant 0 : index
    %c0_1 = arith.constant 0 : index
    %3 = vector.load %arg11[%c0, %c0_1] : memref<8x32xf32, #tpu.memory_space<vmem>>, vector<8x32xf32>
    %c0_2 = arith.constant 0 : index
    %c0_3 = arith.constant 0 : index
    %c0_4 = arith.constant 0 : index
    %4 = vector.load %arg5[%c0_2, %c0_3, %c0_4] : memref<1x32x8xf32, #tpu.memory_space<vmem>>, vector<1x32x8xf32>
    %5 = vector.shape_cast %4 : vector<1x32x8xf32> to vector<32x8xf32>
    %cst = arith.constant dense<0.000000e+00> : vector<8x8xf32>
    %6 = tpu.matmul %3, %5, %cst {dimension_numbers = #tpu.dot_dimension_numbers<[1], [0], [0], [1], [0, 0, 1, 1], [], []>} : vector<8x32xf32>, vector<32x8xf32>, vector<8x8xf32> -> vector<8x8xf32>
    %c0_5 = arith.constant 0 : index
    %c0_6 = arith.constant 0 : index
    %c0_7 = arith.constant 0 : index
    %7 = vector.load %arg6[%c0_5, %c0_6, %c0_7] : memref<1x32x8xf32, #tpu.memory_space<vmem>>, vector<1x32x8xf32>
    %8 = vector.shape_cast %7 : vector<1x32x8xf32> to vector<32x8xf32>
    %cst_8 = arith.constant dense<0.000000e+00> : vector<8x8xf32>
    %9 = tpu.matmul %3, %8, %cst_8 {dimension_numbers = #tpu.dot_dimension_numbers<[1], [0], [0], [1], [0, 0, 1, 1], [], []>} : vector<8x32xf32>, vector<32x8xf32>, vector<8x8xf32> -> vector<8x8xf32>
    %c0_9 = arith.constant 0 : index
    %c0_10 = arith.constant 0 : index
    %c0_11 = arith.constant 0 : index
    %10 = vector.load %arg7[%c0_9, %c0_10, %c0_11] : memref<1x32x8xf32, #tpu.memory_space<vmem>>, vector<1x32x8xf32>
    %11 = vector.shape_cast %10 : vector<1x32x8xf32> to vector<32x8xf32>
    %cst_12 = arith.constant dense<0.000000e+00> : vector<8x8xf32>
    %12 = tpu.matmul %3, %11, %cst_12 {dimension_numbers = #tpu.dot_dimension_numbers<[1], [0], [0], [1], [0, 0, 1, 1], [], []>} : vector<8x32xf32>, vector<32x8xf32>, vector<8x8xf32> -> vector<8x8xf32>
    %cst_13 = arith.constant dense<0.000000e+00> : vector<8x8xf32>
    %13 = tpu.matmul %6, %9, %cst_13 {dimension_numbers = #tpu.dot_dimension_numbers<[1], [1], [0], [0], [0, 0, 1, 0], [], []>} : vector<8x8xf32>, vector<8x8xf32>, vector<8x8xf32> -> vector<8x8xf32>
    %cst_14 = arith.constant 0.353553385 : f32
    %14 = vector.broadcast %cst_14 : f32 to vector<8x8xf32>
    %15 = arith.mulf %13, %14 : vector<8x8xf32>
    %16 = tpu.iota {dimensions = array<i32: 0>} : vector<8x8xi32>
    %17 = tpu.iota {dimensions = array<i32: 1>} : vector<8x8xi32>
    %18 = arith.cmpi sge, %16, %17 : vector<8x8xi32>
    %cst_15 = arith.constant -1.000000e+30 : f32
    %19 = vector.broadcast %cst_15 : f32 to vector<8x8xf32>
    %20 = arith.select %18, %15, %19 : vector<8x8xi1>, vector<8x8xf32>
    %cst_16 = arith.constant dense<0xFF800000> : vector<8xf32>
    %21 = vector.multi_reduction <maximumf>, %20, %cst_16 [1] : vector<8x8xf32> to vector<8xf32>
    %22 = vector.shape_cast %21 : vector<8xf32> to vector<8x1xf32>
    %23 = vector.broadcast %22 : vector<8x1xf32> to vector<8x8xf32>
    %24 = arith.subf %20, %23 : vector<8x8xf32>
    %25 = math.exp %24 : vector<8x8xf32>
    %cst_17 = arith.constant dense<0.000000e+00> : vector<8xf32>
    %26 = vector.multi_reduction <add>, %25, %cst_17 [1] : vector<8x8xf32> to vector<8xf32>
    %27 = vector.shape_cast %26 : vector<8xf32> to vector<8x1xf32>
    %28 = tpu.reciprocal %27 {approx = true} : vector<8x1xf32> -> vector<8x1xf32>
    %29 = vector.broadcast %28 : vector<8x1xf32> to vector<8x8xf32>
    %30 = arith.mulf %25, %29 : vector<8x8xf32>
    %cst_18 = arith.constant dense<0.000000e+00> : vector<8x8xf32>
    %31 = tpu.matmul %30, %12, %cst_18 {dimension_numbers = #tpu.dot_dimension_numbers<[1], [0], [0], [1], [0, 0, 1, 1], [], []>} : vector<8x8xf32>, vector<8x8xf32>, vector<8x8xf32> -> vector<8x8xf32>
    %c0_19 = arith.constant 0 : index
    %c0_20 = arith.constant 0 : index
    %32 = vector.load %arg12[%c0_19, %c0_20] : memref<8x32xf32, #tpu.memory_space<vmem>>, vector<8x32xf32>
    %c0_21 = arith.constant 0 : index
    %c0_22 = arith.constant 0 : index
    %c0_23 = arith.constant 0 : index
    %33 = vector.load %arg8[%c0_21, %c0_22, %c0_23] : memref<1x8x32xf32, #tpu.memory_space<vmem>>, vector<1x8x32xf32>
    %34 = vector.shape_cast %33 : vector<1x8x32xf32> to vector<8x32xf32>
    %cst_24 = arith.constant dense<0.000000e+00> : vector<8x32xf32>
    %35 = tpu.matmul %31, %34, %cst_24 {dimension_numbers = #tpu.dot_dimension_numbers<[1], [0], [0], [1], [0, 0, 1, 1], [], []>} : vector<8x8xf32>, vector<8x32xf32>, vector<8x32xf32> -> vector<8x32xf32>
    %36 = arith.addf %32, %35 : vector<8x32xf32>
    %c0_25 = arith.constant 0 : index
    %c0_26 = arith.constant 0 : index
    %37 = vector.load %arg12[%c0_25, %c0_26] : memref<8x32xf32, #tpu.memory_space<vmem>>, vector<8x32xf32>
    tpu.vector_store %arg12[%c0_25, %c0_26], %36 {strides = array<i32>} : memref<8x32xf32, #tpu.memory_space<vmem>>, vector<8x32xf32>,
    %c3_i32 = arith.constant 3 : i32
    %38 = arith.cmpi eq, %arg1, %c3_i32 : i32
    %39 = arith.extui %38 : i1 to i32
    %c0_i32_27 = arith.constant 0 : i32
    %40 = arith.cmpi ne, %39, %c0_i32_27 : i32
    scf.if %40 {
      %c0_28 = arith.constant 0 : index
      %c0_29 = arith.constant 0 : index
      %c0_30 = arith.constant 0 : index
      %41 = vector.load %arg2[%c0_28, %c0_29, %c0_30] : memref<1x8x32xf32, #tpu.memory_space<vmem>>, vector<1x8x32xf32>
      %42 = vector.shape_cast %41 : vector<1x8x32xf32> to vector<8x32xf32>
      %c0_31 = arith.constant 0 : index
      %c0_32 = arith.constant 0 : index
      %43 = vector.load %arg12[%c0_31, %c0_32] : memref<8x32xf32, #tpu.memory_space<vmem>>, vector<8x32xf32>
      %44 = arith.addf %42, %43 : vector<8x32xf32>
      %c0_33 = arith.constant 0 : index
      %c0_34 = arith.constant 0 : index
      %45 = vector.load %arg9[%c0_33, %c0_34] : memref<1x32xf32, #tpu.memory_space<vmem>>, vector<1x32xf32>
      %46 = vector.broadcast %45 : vector<1x32xf32> to vector<8x32xf32>
      %47 = arith.addf %44, %46 : vector<8x32xf32>
      %c0_35 = arith.constant 0 : index
      %c0_36 = arith.constant 0 : index
      %c0_37 = arith.constant 0 : index
      %48 = vector.load %arg10[%c0_35, %c0_36, %c0_37] : memref<1x8x32xf32, #tpu.memory_space<vmem>>, vector<1x8x32xf32>
      %49 = vector.shape_cast %48 : vector<1x8x32xf32> to vector<8x32xf32>
      %50 = vector.shape_cast %47 : vector<8x32xf32> to vector<1x8x32xf32>
      tpu.vector_store %arg10[%c0_35, %c0_36, %c0_37], %50 {strides = array<i32>} : memref<1x8x32xf32, #tpu.memory_space<vmem>>, vector<1x8x32xf32>,
    } else {
    }
    return
  }
  func.func @transform_0(%arg0: i32, %arg1: i32) -> (i32, i32, i32) {
    %c0_i32 = arith.constant 0 : i32
    %c0_i32_0 = arith.constant 0 : i32
    %c0_i32_1 = arith.constant 0 : i32
    return %arg0, %c0_i32, %c0_i32_0 : i32, i32, i32
  }
  func.func @transform_1(%arg0: i32, %arg1: i32) -> (i32, i32) {
    %c0_i32 = arith.constant 0 : i32
    %c0_i32_0 = arith.constant 0 : i32
    %c0_i32_1 = arith.constant 0 : i32
    return %c0_i32, %c0_i32_0 : i32, i32
  }
  func.func @transform_2(%arg0: i32, %arg1: i32) -> (i32, i32) {
    %c0_i32 = arith.constant 0 : i32
    %c0_i32_0 = arith.constant 0 : i32
    %c0_i32_1 = arith.constant 0 : i32
    return %c0_i32, %c0_i32_0 : i32, i32
  }
  func.func @transform_3(%arg0: i32, %arg1: i32) -> (i32, i32, i32) {
    %c0_i32 = arith.constant 0 : i32
    %c0_i32_0 = arith.constant 0 : i32
    %c0_i32_1 = arith.constant 0 : i32
    return %arg1, %c0_i32, %c0_i32_0 : i32, i32, i32
  }
  func.func @transform_4(%arg0: i32, %arg1: i32) -> (i32, i32, i32) {
    %c0_i32 = arith.constant 0 : i32
    %c0_i32_0 = arith.constant 0 : i32
    %c0_i32_1 = arith.constant 0 : i32
    return %arg1, %c0_i32, %c0_i32_0 : i32, i32, i32
  }
  func.func @transform_5(%arg0: i32, %arg1: i32) -> (i32, i32, i32) {
    %c0_i32 = arith.constant 0 : i32
    %c0_i32_0 = arith.constant 0 : i32
    %c0_i32_1 = arith.constant 0 : i32
    return %arg1, %c0_i32, %c0_i32_0 : i32, i32, i32
  }
  func.func @transform_6(%arg0: i32, %arg1: i32) -> (i32, i32, i32) {
    %c0_i32 = arith.constant 0 : i32
    %c0_i32_0 = arith.constant 0 : i32
    %c0_i32_1 = arith.constant 0 : i32
    return %arg1, %c0_i32, %c0_i32_0 : i32, i32, i32
  }
  func.func @transform_7(%arg0: i32, %arg1: i32) -> (i32, i32) {
    %c0_i32 = arith.constant 0 : i32
    %c0_i32_0 = arith.constant 0 : i32
    %c0_i32_1 = arith.constant 0 : i32
    return %c0_i32, %c0_i32_0 : i32, i32
  }
  func.func @transform_8(%arg0: i32, %arg1: i32) -> (i32, i32, i32) {
    %c0_i32 = arith.constant 0 : i32
    %c0_i32_0 = arith.constant 0 : i32
    %c0_i32_1 = arith.constant 0 : i32
    return %arg0, %c0_i32, %c0_i32_0 : i32, i32, i32
  }
}

</mosaic_0001>

<bundles_post_ra>
// kernel: tpu_custom_call.1
= control target key start
LH: loop header
LB: loop body
LE: loop exit
PB: predicated region body
PF: predicated region fallthrough
CT: control target
= control target key end

     0   :  { %s1574_s0 = inlined_call_operand.vmem [shape: f32[2,8,32], index: 0, kind: input, shape index: {}]   ;;  %s1575_s1 = inlined_call_operand.vmem [shape: f32[1,32], index: 1, kind: input, shape index: {}]   ;;  %s1576_s2 = inlined_call_operand.vmem [shape: f32[1,32], index: 2, kind: input, shape index: {}]   ;;  %s1577_s3 = inlined_call_operand.vmem [shape: f32[4,32,8], index: 3, kind: input, shape index: {}]   ;;  %s1578_s4 = inlined_call_operand.vmem [shape: f32[4,32,8], index: 4, kind: input, shape index: {}]   ;;  %s1579_s5 = inlined_call_operand.vmem [shape: f32[4,32,8], index: 5, kind: input, shape index: {}]   ;;  %s1580_s6 = inlined_call_operand.vmem [shape: f32[4,8,32], index: 6, kind: input, shape index: {}]   ;;  %s1581_s7 = inlined_call_operand.vmem [shape: f32[1,32], index: 7, kind: input, shape index: {}]   ;;  %s1582_s8 = inlined_call_operand.hbm [shape: f32[2,8,32], index: 8, kind: output, shape index: {}]  }
   0x1   :  { %1590 = sst [smem:[#allocation15_spill]] %s1574_s0 }
   0x2   :  { %13 = vsyncpa [#allocation5], 0 }
   0x3   :  { %15 = vsyncpa [#allocation5 + $0x1], 0  ;;  %s1373_s27 = smov 0   ;;  %s1375_s28 = smov 0  }
   0x4   :  { %s1377_s29 = smov 0   ;;  %s1379_s30 = smov 0  }
   0x5   :  { %s1381_s9 = smov 0   ;;  %s1383_s10 = smov 0  }
   0x6   :  { %s1385_s11 = smov 0   ;;  %s1387_s12 = smov 0  }
   0x7 LB: > { %1591 = sst [smem:[#allocation7_spill]] %s1294_s27  ;;  %s1048_s13 = sadd.s32 4294967295, %s1322_s12   ;;  %s1322_s12 = sphi %s1387_s12, %s21_s12   ;;  %s1318_s11 = sphi %s1385_s11, %s1610_s11   ;;  %s1314_s10 = sphi %s1383_s10, %s1609_s10   ;;  %s1310_s9 = sphi %s1381_s9, %s1608_s9   ;;  %s1306_s30 = sphi %s1379_s30, %s1607_s30   ;;  %s1302_s29 = sphi %s1377_s29, %s1606_s29   ;;  %s1298_s28 = sphi %s1375_s28, %s1612_s28   ;;  %s1294_s27 = sphi %s1373_s27, %s1611_s27  }
   0x8   : > { %1592 = sst [smem:[#allocation8_spill]] %s1302_s29  ;;  %s1049_s14 = sadd.s32 4294967294, %s1322_s12  }
   0x9   : > { %1593 = sst [smem:[#allocation9_spill]] %s1314_s10  ;;  %s30_s15 = sadd.s32 1, %s1314_s10 }
   0xa   : > { %1594 = sst [smem:[#allocation10_spill]] %s1318_s11  ;;  %p31_p0 = scmp.ge.s32.totalorder %s30_s15, 4 }
   0xb   : > { %s33_s16 = sadd.s32 1, %s1318_s11  ;;  %p243_p1 = scmp.ne.s32.totalorder %s1302_s29, %s1298_s28 }
   0xc   : > { %p244_p2 = scmp.eq.s32.totalorder %s1048_s13, 7  ;;  %s1614_s15 = smov (%p31_p0, %s30_s15), 0 }
   0xd   : > { %1595 = sst [smem:[#allocation11_spill]] %s1614_s15  ;;  %s1616_s16 = smov (!%p31_p0, %s33_s16), %s1318_s11 }
   0xe   : > { %p1422_p3 = por %p244_p2, %p243_p1  ;;  %p249_p4 = scmp.ne.s32.totalorder %s1298_s28, %s1294_s27 }
   0xf   : > { %p35_p5 = scmp.ge.s32.totalorder %s1616_s16, 2  ;;  %p250_p6 = scmp.eq.s32.totalorder %s1049_s14, 7 }
  0x10   : > { %p1052_p7 = scmp.ge.s32.totalorder %s1322_s12, 1  ;;  %p315_p8 = scmp.lt.s32.totalorder %s1322_s12, 9 }
  0x11   : > { %s1618_s16 = smov (%p35_p5, %s1616_s16), 0  ;;  %p1432_p9 = por %p250_p6, %p249_p4 }
  0x12   : > { %1597 = sst [smem:[#allocation12_spill]] %s1618_s16  ;;  %p316_p10 = pnand %p1052_p7, %p315_p8 }
  0x13   : > { %s1598_s18 = scalar_select %p1432_p9, 1, 0 }
  0x14   : > { %s230_s19 = ssub.s32 %s1318_s11, %s1618_s16  ;;  %s233_s20 = sadd.s32 1, %s1302_s29 }
  0x15   : > { %1599 = sst [smem:[#allocation13_spill]] %s1598_s18  ;;  %p231_p11 = scmp.eq.s32.totalorder %s230_s19, 0 }
  0x16   : > { %319 = sbr.rel (%p316_p10) target bundleno = 1482 (0x5ca), region = 52  ;;  %s1586_s22 = sand.u32 (!%p316_p10), 1, %s1298_s28  }
  0x17   : > { %s1440_s21 = scalar_select %p231_p11, %s1302_s29, %s233_s20  }
  0x18   : > { %p367_p12 = scmp.lt.s32.totalorder (!%p316_p10), %s1310_s9, 1  ;;  %s1446_s23 = sshll.u32 (!%p316_p10), %s1586_s22, 3 }
  0x19   : > { %1600 = sst [smem:[#allocation14_spill]] %s1440_s21  ;;  %p371_p13 = scmp.lt.s32.totalorder (!%p316_p10), %s1306_s30, 3 }
  0x1a   : > { %s1601_s0 = sld [smem:[#allocation15_spill]] (!%p316_p10)  ;;  %p1062_p0 = scmp.ne.s32.totalorder (!%p316_p10), %s1306_s30, 0 }
  0x1b   : > { %s368_s24 = scalar_select %p367_p12, %s1310_s9, 1 }
  0x1c   : > { %s372_s25 = scalar_select %p371_p13, %s1306_s30, 3 }
  0x1d   : > { %s1054_s26 = sshll.u32 %s368_s24, 3  ;;  %393 = sbr.rel (%p1062_p0) target bundleno = 344 (0x158), region = 56 }
  0x1e   : > { %s1078_s20 = sshll.u32 %s372_s25, 5  ;;  %s1061_s27 = sshll.u32 %s372_s25, 3 }
  0x1f   : > { %s1459_s11 = scalar_lea.vmem %s1577_s3, %s1078_s20  ;;  %s1464_s22 = scalar_lea.vmem %s1578_s4, %s1078_s20 }
  0x20   : > { %s1454_s19 = scalar_lea.vmem %s1601_s0, %s1054_s26  ;;  %s1469_s24 = scalar_lea.vmem %s1579_s5, %s1078_s20 }
  0x21   : > { %s1474_s14 = scalar_lea.vmem %s1580_s6, %s1061_s27  ;;  %s366_s0 = scalar_lea.vmem [#allocation4], %s1446_s23 }
  0x22   : > { %v394_v0 = vld [vmem:[%s1454_s19] sm:$0xff]  ;;  %vm397_vm0 = vcmask 261120   ;;  %v1324_v2 = vmov 0.0  }
  0x23   : > { %v398_v1 = vsel %vm397_vm0, %v394_v0, 0.0  ;;  %427 = vst.msk [vmem:[#allocation3] sm:$0xff] %vm397_vm0, %v1324_v2  ;;  %v1063_v12 = vld [vmem:[%s1575_s1] ss:$0 sm:$0xff] }
  0x24   : > { %399 = vadd.xlane.f32.xlu0 %v398_v1  ;;  %v1064_v14 = vld [vmem:[%s1576_s2] ss:$0 sm:$0xff] }
  0xad   : > { %v400_v3 = vpop.xlane.xlu0 %399 }
  0xae   : > { %v402_v4 = vmul.f32 0.03125, %v400_v3 }
  0xb0   : > { %v403_v5 = vsub.f32 %v394_v0, %v402_v4 }
  0xb2   : > { %v404_v6 = vmul.f32 %v403_v5, %v403_v5 }
  0xb4   : > { %v405_v7 = vsel %vm397_vm0, %v404_v6, 0.0 }
  0xb5   : > { %406 = vadd.xlane.f32.xlu0 %v405_v7 }
 0x13e   : > { %v407_v8 = vpop.xlane.xlu0 %406 }
 0x13f   : > { %v408_v9 = vmul.f32 0.03125, %v407_v8 }
 0x141   : > { %v409_v10 = vadd.f32 1e-05, %v408_v9 }
 0x143   : > { %1224 = vrsqrt.f32 %v409_v10 }
 0x150   : > { %v1225_v11 = vpop.eup %1224 }
 0x151   : > { %v411_v13 = vmul.f32 %v1225_v11, %v403_v5 }
 0x153   : > { %v418_v15 = vmul.f32 %v1063_v12, %v411_v13 }
 0x155   : > { %v425_v16 = vadd.f32 %v1064_v14, %v418_v15 }
 0x157   : > { %426 = vst.msk [vmem:[#allocation2] sm:$0xff] %vm397_vm0, %v425_v16 }
 0x158 PF: > { %v510_v17 = vld [vmem:[%s1464_s22 + $0x18] sm:$0xff]  ;;  %v1325_v19 = vmov 0.0   ;;  %v509_v20 = vld [vmem:[%s1464_s22 + $0x10] sm:$0xff]  ;;  %v508_v22 = vld [vmem:[%s1464_s22 + $0x8] sm:$0xff]  ;;  %vm433_vm1 = vcmask 261120   ;;  %vm1326_vm2 = vmmov 0   ;;  %v733_v35 = vlaneseq }
 0x159   : > { %v432_v18 = vld [vmem:[%s1459_s11 + $0x18] sm:$0xff]  ;;  %1113 = vmatprep.subr.mxu1 %v1325_v19  ;;  %1102 = vmatprep.subr.mxu0 %v1325_v19  ;;  %v431_v21 = vld [vmem:[%s1459_s11 + $0x10] sm:$0xff]  ;;  %v430_v23 = vld [vmem:[%s1459_s11 + $0x8] sm:$0xff]  ;;  %vm655_vm3 = vcmask 64512   ;;  %p1072_p1 = scmp.ne.s32.totalorder %s1306_s30, 3 }
 0x15a   : > { %1114 = vmatpush3.msra.mxu1 %v510_v17  ;;  %1103 = vmatpush3.msra.mxu0 %v432_v18  ;;  %v507_v24 = vld [vmem:[%s1464_s22] sm:$0xff]  ;;  %v584_v31 = vld [vmem:[%s1469_s24 + $0x18] sm:$0xff]  ;;  %v583_v32 = vld [vmem:[%s1469_s24 + $0x10] sm:$0xff]  ;;  %v734_v36 = vshrl.u32 %v733_v35, 7  ;;  %v736_v37 = vand.u32 127, %v733_v35 }
 0x15b   : > { %1115 = vmatprep.subr.mxu1 %v1325_v19  ;;  %1104 = vmatprep.subr.mxu0 %v1325_v19  ;;  %v429_v26 = vld [vmem:[%s1459_s11] sm:$0xff]  ;;  %v582_v33 = vld [vmem:[%s1469_s24 + $0x8] sm:$0xff] }
 0x15c   : > { %1116 = vmatpush3.msra.mxu1 %v509_v20  ;;  %1105 = vmatpush3.msra.mxu0 %v431_v21  ;;  %v581_v34 = vld [vmem:[%s1469_s24] sm:$0xff]  ;;  %vm737_vm4 = vcmp.ge.s32.totalorder %v734_v36, %v736_v37  ;;  %v823_v56 = vld [vmem:[#allocation3] sm:$0xff] }
 0x15d   : > { %1117 = vmatprep.subr.mxu1 %v1325_v19  ;;  %1106 = vmatprep.subr.mxu0 %v1325_v19  ;;  %v824_v50 = vld [vmem:[%s1474_s14] sm:$0xff] }
 0x15e   : > { %1118 = vmatpush3.msra.mxu1 %v508_v22  ;;  %1107 = vmatpush3.msra.mxu0 %v430_v23  ;;  %v428_v25 = vld [vmem:[#allocation2] sm:$0xff] }
 0x15f   : > { %1119 = vmatprep.subr.mxu1 %v1325_v19  ;;  %1121 = vmatprep.mubr.msk.f32.mxu1 %vm1326_vm2, %v1325_v19 }
 0x160   : > { %1120 = vmatpush3.msra.mxu1 %v507_v24  ;;  %1108 = vmatprep.subr.mxu0 %v1325_v19 }
 0x161   : > { %1122 = vmatmul.mubr.msk.f32.vlgmr.msra.gmra.mxu1 %vm433_vm1, %v428_v25  ;;  %1109 = vmatpush3.msra.mxu0 %v429_v26 }
 0x162   : > { %1110 = vmatprep.mubr.msk.f32.mxu0 %vm1326_vm2, %v1325_v19  ;;  %1135 = vmatprep.subr.mxu1 %v1325_v19 }
 0x163   : > { %1111 = vmatmul.mubr.msk.f32.vlgmr.msra.gmra.mxu0 %vm433_vm1, %v428_v25  ;;  %1137 = vmatprep.mubr.msk.f32.mxu1 %vm1326_vm2, %v1325_v19 }
 0x164   : > { %1124 = vmatprep.subr.mxu0 %v1325_v19  ;;  %1132 = vmatprep.mubr.msk.f32.mxu0 %vm1326_vm2, %v1325_v19 }
 0x165   : > { %1125 = vmatpush3.msra.mxu0 %v584_v31 }
 0x166   : > { %1126 = vmatprep.subr.mxu0 %v1325_v19 }
 0x167   : > { %1127 = vmatpush3.msra.mxu0 %v583_v32 }
 0x168   : > { %1128 = vmatprep.subr.mxu0 %v1325_v19 }
 0x169   : > { %1129 = vmatpush3.msra.mxu0 %v582_v33 }
 0x16a   : > { %1130 = vmatprep.subr.mxu0 %v1325_v19 }
 0x16b   : > { %1131 = vmatpush3.msra.mxu0 %v581_v34 }
 0x16c   : > { %1133 = vmatmul.mubr.msk.f32.vlgmr.msra.gmra.mxu0 %vm433_vm1, %v428_v25  ;;  %1145 = vmatprep.subr.mxu0 %v1325_v19 }
 0x16d   : > { %1147 = vmatprep.mubr.msk.f32.mxu0 %vm1326_vm2, %v1325_v19  ;;  %1146 = vmatpush3.msra.mxu0 %v824_v50 }
 0x221   : > { %v577_v27 = vpop.f32.mrf.mxu1 }
 0x222   : > { %1136 = vmatpush3.xpose.msk.msra.mxu1 %vm655_vm3, %v577_v27 }
 0x223   : > { %v503_v28 = vpop.f32.mrf.mxu0  ;;  %v1123_v29 = vpop.f32.mrf.mxu1  ;;  %1140 = vmatprep.subr.mxu1 %v1325_v19 }
 0x225   : > { %v1112_v30 = vpop.f32.mrf.mxu0  ;;  %1138 = vmatmul.mubr.msk.f32.vlgmr.msra.gmra.mxu1 %vm655_vm3, %v503_v28 }
 0x226   : > { %1142 = vmatprep.mubr.msk.f32.mxu1 %vm1326_vm2, %v1325_v19 }
 0x22c   : > { %v651_v48 = vpop.f32.mrf.mxu0 }
 0x22d   : > { %1141 = vmatpush3.msra.mxu1 %v651_v48 }
 0x22e   : > { %v1134_v49 = vpop.f32.mrf.mxu0 }
 0x2e5   : > { %v728_v38 = vpop.f32.mrf.mxu1 }
 0x2e6   : > { %v732_v39 = vmul.f32 0.35355338, %v728_v38 }
 0x2e7   : > { %v1139_v40 = vpop.f32.mrf.mxu1 }
 0x2e8   : > { %v738_v41 = vsel %vm737_vm4, %v732_v39, -1e+30 }
 0x2e9   : > { %v739_v42 = vsel %vm655_vm3, %v738_v41, -inf }
 0x2ea   : > { %740 = vmax.xlane.f32.xlu0 %v739_v42 }
 0x373   : > { %v741_v43 = vpop.xlane.xlu0 %740 }
 0x374   : > { %v742_v44 = vsub.f32 %v738_v41, %v741_v43 }
 0x376   : > { %v743_v45 = vmul.f32 1.442695, %v742_v44 }
 0x378   : > { %1226 = vpow2.f32 %v743_v45 }
 0x385   : > { %v1227_v46 = vpop.eup %1226 }
 0x386   : > { %v745_v47 = vsel %vm655_vm3, %v1227_v46, 0.0 }
 0x387   : > { %746 = vadd.xlane.f32.xlu0 %v745_v47 }
 0x410   : > { %v747_v51 = vpop.xlane.xlu0 %746 }
 0x411   : > { %1228 = vrcp.f32 %v747_v51 }
 0x41e   : > { %v1229_v52 = vpop.eup %1228 }
 0x41f   : > { %v749_v53 = vmul.f32 %v1229_v52, %v1227_v46 }
 0x421   : > { %1143 = vmatmul.mubr.msk.f32.vlgmr.msra.gmra.mxu1 %vm655_vm3, %v749_v53 }
 0x4e1   : > { %v819_v54 = vpop.f32.mrf.mxu1 }
 0x4e2   : > { %1148 = vmatmul.mubr.msk.f32.vlgmr.msra.gmra.mxu0 %vm655_vm3, %v819_v54 }
 0x4e3   : > { %v1144_v55 = vpop.f32.mrf.mxu1 }
 0x5a1   : > { %903 = sbr.rel (%p1072_p1) target bundleno = 1458 (0x5b2), region = 60 }
 0x5a2   : > { %v894_v57 = vpop.f32.mrf.mxu0 }
 0x5a3   : > { %v898_v58 = vadd.f32 %v894_v57, %v823_v56 }
 0x5a4   : > { %v1149_v59 = vpop.f32.mrf.mxu0 }
 0x5a5   : > { %899 = vst.msk [vmem:[#allocation3] sm:$0xff] %vm433_vm1, %v898_v58 }
 0x5a6   : > { %v904_v60 = vld [vmem:[%s1454_s19] sm:$0xff] }
 0x5a7   : > { %v1073_v62 = vld [vmem:[%s1581_s7] ss:$0 sm:$0xff] }
 0x5ac   : > { %v905_v61 = vld [vmem:[#allocation3] sm:$0xff] }
 0x5ad   : > { %v906_v63 = vadd.f32 %v905_v61, %v904_v60 }
 0x5af   : > { %v914_v0 = vadd.f32 %v1073_v62, %v906_v63 }
 0x5b1   : > { %915 = vst.msk [vmem:[%s366_s0] sm:$0xff] %vm433_vm1, %v914_v0 }
 0x5b2 PF: > { %s1075_s30 = sshll.u32 %s1310_s9, 7  ;;  %s930_s25 = sshll.u32 %s366_s0, 4  ;;  %s931_s25 = int_to_ptr.vmem [resolvable:$true] %s930_s25 }
 0x5b3   : > { %s928_s22 = scalar_lea.hbm %s1582_s8, %s1075_s30  ;;  %s1602_s19 = sand.u32 1, %s1298_s28  }
 0x5b4   : > { %s917_s20 = scalar_lea.sflag [#allocation5], %s1602_s19  ;;  %s1230_s24 = scalar_lea.vmem %s931_s25, 128 }
 0x5b5   : > { %p1231_p2 = scmp.ne.s32.totalorder %s931_s25, %s1230_s24  ;;  %s1327_s13 = smov [#allocation4]  }
 0x5b6   : > { %s1234_s26 = sshll.u32 %s1327_s13, 4  ;;  %s1235_s26 = int_to_ptr.vmem [resolvable:$false] %s1234_s26 }
 0x5b7   : > { %p1232_p4 = pnand %p1231_p2, %p1422_p3  ;;  %s1236_s14 = scalar_lea.vmem %s1235_s26, 256 }
 0x5b8   : > { %p1237_p6 = scmp.lt.s32.totalorder %s931_s25, %s1235_s26  ;;  %p1238_p7 = scmp.lt.s32.totalorder %s1236_s14, %s1230_s24 }
 0x5b9   : > { %p1233_p5 = pneg %p1232_p4 }
 0x5ba   : > { %p1239_p8 = por %p1238_p7, %p1237_p6 }
 0x5bc   : > { %p1240_p10 = pnand %p1239_p8, %p1233_p5 }
 0x5be   : > { %1243 = shalt.err (!%p1240_p10)
}
 0x5bf   : > { %s1244_s9 = scalar_lea.hbm %s928_s22, 128  ;;  %s1248_s27 = scalar_lea.hbm %s1582_s8, 256 }
 0x5c0   : > { %p1245_p11 = scmp.ne.s32.totalorder %s928_s22, %s1244_s9  ;;  %p1249_p0 = scmp.lt.s32.totalorder %s928_s22, %s1582_s8 }
 0x5c1   : > { %p1250_p1 = scmp.lt.s32.totalorder %s1248_s27, %s1244_s9 }
 0x5c2   : > { %p1246_p12 = pnand %p1245_p11, %p1422_p3 }
 0x5c3   : > { %p1251_p2 = por %p1250_p1, %p1249_p0 }
 0x5c4   : > { %p1247_p13 = pneg %p1246_p12 }
 0x5c6   : > { %p1252_p4 = pnand %p1251_p2, %p1247_p13 }
 0x5c8   : > { %1255 = shalt.err (!%p1252_p4)
}
 0x5c9   : > { %1150 = dma.vmem_to_hbm [thread:$0]  (%p1422_p3), %s931_s25, 128, %s928_s22, %s917_s20  }
 0x5ca PF: > { %s1603_s15 = sld [smem:[#allocation7_spill]]  ;;  %p1156_p5 = scmp.ge.s32.totalorder %s1322_s12, 2 }
 0x5cc   : > { %p1153_p6 = pnand %p1156_p5, %p1432_p9 }
 0x5ce   : > { %p1154_p7 = pneg %p1153_p6 }
 0x5d0   : > { %s942_s16 = sand.u32 1, %s1603_s15  }
 0x5d1   : > { %s943_s30 = scalar_lea.sflag [#allocation5], %s942_s16 }
 0x5d2   : > { %1289 = dma.done.wait (%p1154_p7), %s943_s30, 128  }
 0x5d3   : > { %1291 = vsyncadd (%p1154_p7), %s943_s30, 4294967168  ;;  %s21_s12 = sadd.s32 1, %s1322_s12   ;;  %s1605_s18 = sld [smem:[#allocation8_spill]] }
 0x5d4   : > { %p18_p8 = scmp.ge.s32.totalorder %s21_s12, 10   ;;  %s1606_s29 = sld [smem:[#allocation14_spill]] }
 0x5d5   : > { %s1607_s30 = sld [smem:[#allocation9_spill]]  ;;  %s1611_s27 = smov %s1298_s28 }
 0x5d6   : > { %s1608_s9 = sld [smem:[#allocation10_spill]]  ;;  %20 = sbr.rel (!%p18_p8) target bundleno = 7 (0x7), region = 107 }
 0x5d7   : > { %s1609_s10 = sld [smem:[#allocation11_spill]] }
 0x5d8   : > { %s1610_s11 = sld [smem:[#allocation12_spill]] }
 0x5d9   : > { %s1612_s28 = smov %s1605_s18 }
 0x5db   :  { %948 = vsyncpa [#allocation5], 1 }
 0x5dc   :  { %950 = vsyncpa [#allocation5 + $0x1], 1 }

</bundles_post_ra>
